<compile_context>
chip_gen: v7x
topology: tpu7x:2x2x1
jax: 0.10.0
libtpu: 0.0.40
codegen_flags: <defaults>
</compile_context>

<pallas_src>
import functools

import jax
import jax.numpy as jnp
from jax import lax
from jax.experimental import pallas as pl
from jax.experimental.pallas import tpu as pltpu


def _round_up(x, m):
    return (x + m - 1) // m * m


def _mfb_kernel(f1_ref, f2_ref, wi_ref, bi_ref, wq_ref, bq_ref, out_ref, *, C, F):
    # Fused projections: (tb, F) @ (F, C*F) on the MXU, f32 accumulation.
    p1 = jnp.dot(f1_ref[...], wi_ref[...], preferred_element_type=jnp.float32) + bi_ref[...]
    p2 = jnp.dot(f2_ref[...], wq_ref[...], preferred_element_type=jnp.float32) + bq_ref[...]

    # Elementwise product on full 128-lane vregs.
    e = p1 * p2                                           # (tb, C*F), f32
    # TODO(synk): nn.Dropout(0.1) is identity at inference; training-mode dropout not applied.

    # Sum-pool over the C column blocks == AvgPool1d(C, stride=C)(e) * C
    # (column block c holds original output features {j*C + c : j}).
    z = e[:, 0:F]
    for c in range(1, C):
        z = z + e[:, c * F:(c + 1) * F]                   # static lane slices

    # Row-wise L2 normalize; rsqrt(max(sumsq, 1e-24)) == 1 / max(||z||, 1e-12)
    sumsq = jnp.sum(z * z, axis=-1, keepdims=True)
    inv = lax.rsqrt(jnp.maximum(sumsq, 1e-24))
    out_ref[...] = (z * inv).astype(out_ref.dtype)


def prepare_mfb_params(w_i, b_i, w_q, b_q, C, compute_dtype=jnp.bfloat16):
    """One-time (hoisted) prep: fuse each Linear weight into a lane-dense (F, C*F) RHS.

    Fused column c*F + j equals original output feature j*C + c, so summing the
    C column blocks of the fused projection reproduces the consecutive-C
    AvgPool1d(C, stride=C) * C exactly.
    """
    CF, F = w_i.shape
    assert CF == C * F and w_q.shape == (CF, F) and b_i.shape == (CF,) and b_q.shape == (CF,)
    wi = jnp.concatenate([w_i[c::C, :].T for c in range(C)], axis=1).astype(compute_dtype)  # (F, C*F)
    wq = jnp.concatenate([w_q[c::C, :].T for c in range(C)], axis=1).astype(compute_dtype)  # (F, C*F)
    bi = jnp.concatenate([b_i[c::C] for c in range(C)], axis=0).reshape(1, CF).astype(jnp.float32)
    bq = jnp.concatenate([b_q[c::C] for c in range(C)], axis=0).reshape(1, CF).astype(jnp.float32)
    return wi, bi, wq, bq


def mfb_forward(feat1, feat2, wi, bi, wq, bq, *, block_b=1024, out_dtype=jnp.float32):
    """feat1/feat2: (B, F).  wi/wq: (F, C*F) fused RHS; bi/bq: (1, C*F) f32."""
    B, F = feat1.shape
    F_w, CF = wi.shape
    assert F_w == F and CF % F == 0
    C = CF // F
    compute_dtype = wi.dtype

    f1 = feat1.astype(compute_dtype)
    f2 = feat2.astype(compute_dtype)

    # Batch tile: multiple of 8 sublanes, capped at block_b.
    tb = min(block_b, _round_up(B, 8))
    B_pad = _round_up(B, tb)
    # v7x has 2 TensorCores: keep >=2 "parallel" batch tiles when B allows.
    if B_pad // tb < 2 and tb >= 16:
        tb = _round_up((tb + 1) // 2, 8)
        B_pad = _round_up(B, tb)
    if B_pad != B:
        pad = ((0, B_pad - B), (0, 0))
        f1 = jnp.pad(f1, pad)
        f2 = jnp.pad(f2, pad)

    # Generation-aware VMEM budget (double-buffered feat/out tiles + resident weights).
    isz = jnp.dtype(compute_dtype).itemsize
    osz = jnp.dtype(out_dtype).itemsize
    vmem_est = (2 * 2 * tb * F * isz       # feat1/feat2 tiles, double-buffered
                + 2 * F * CF * isz         # fused W_i / W_q (resident)
                + 2 * CF * 4               # biases
                + 2 * tb * F * osz)        # output tile, double-buffered
    try:
        phys_vmem = pltpu.get_tpu_info().vmem_capacity_bytes
    except Exception:
        phys_vmem = 64 * 1024 * 1024       # conservative (v7x per-TC VMEM)
    vmem_limit = int(min(max(32 * 1024 * 1024, 4 * vmem_est), (3 * phys_vmem) // 4))

    grid = (B_pad // tb,)

    out = pl.pallas_call(
        functools.partial(_mfb_kernel, C=C, F=F),
        out_shape=jax.ShapeDtypeStruct((B_pad, F), out_dtype),
        grid=grid,
        in_specs=[
            pl.BlockSpec((tb, F), lambda b: (b, 0)),     # feat1 tile
            pl.BlockSpec((tb, F), lambda b: (b, 0)),     # feat2 tile
            pl.BlockSpec((F, CF), lambda b: (0, 0)),     # fused W_i (resident)
            pl.BlockSpec((1, CF), lambda b: (0, 0)),     # fused b_i
            pl.BlockSpec((F, CF), lambda b: (0, 0)),     # fused W_q (resident)
            pl.BlockSpec((1, CF), lambda b: (0, 0)),     # fused b_q
        ],
        out_specs=pl.BlockSpec((tb, F), lambda b: (b, 0)),
        compiler_params=pltpu.CompilerParams(
            dimension_semantics=("parallel",),
            vmem_limit_bytes=vmem_limit,
        ),
    )(f1, f2, wi, bi, wq, bq)

    return out[:B] if B_pad != B else out


def mfb_reference(feat1, feat2, w_i, b_i, w_q, b_q, C, compute_dtype=jnp.float32):
    """Pure-JAX reference with the same matmul input dtype / f32 accumulation."""
    B, F = feat1.shape
    p1 = jnp.dot(feat1.astype(compute_dtype), w_i.T.astype(compute_dtype),
                 preferred_element_type=jnp.float32) + b_i
    p2 = jnp.dot(feat2.astype(compute_dtype), w_q.T.astype(compute_dtype),
                 preferred_element_type=jnp.float32) + b_q
    e = p1 * p2
    z = e.reshape(B, F, C).sum(axis=-1)            # AvgPool1d(C, stride=C) * C
    sumsq = jnp.sum(z * z, axis=-1, keepdims=True)
    return z * lax.rsqrt(jnp.maximum(sumsq, 1e-24))


if __name__ == "__main__":
    # Shapes consistent with the module: feat_size=32, C=4 -> C*feat_size=128.
    FEAT, C = 32, 4
    key = jax.random.PRNGKey(0)
    k1, k2, k3, k4, k5, k6, k7, k8 = jax.random.split(key, 8)

    # Deterministic parameters (shapes from nn.Linear(feat_size, C*feat_size)).
    bound = 1.0 / (FEAT ** 0.5)
    w_i = jax.random.uniform(k3, (C * FEAT, FEAT), minval=-bound, maxval=bound, dtype=jnp.float32)
    b_i = jax.random.uniform(k4, (C * FEAT,), minval=-bound, maxval=bound, dtype=jnp.float32)
    w_q = jax.random.uniform(k5, (C * FEAT, FEAT), minval=-bound, maxval=bound, dtype=jnp.float32)
    b_q = jax.random.uniform(k6, (C * FEAT,), minval=-bound, maxval=bound, dtype=jnp.float32)

    # One-time parameter fusion (hoisted out of the per-step forward).
    params = prepare_mfb_params(w_i, b_i, w_q, b_q, C, compute_dtype=jnp.bfloat16)

    # Test 1: small batch, single tile.
    B = 8
    feat1 = jax.random.normal(k1, (B, FEAT), dtype=jnp.float32)
    feat2 = jax.random.normal(k2, (B, FEAT), dtype=jnp.float32)
    out = jax.block_until_ready(mfb_forward(feat1, feat2, *params))
    ref = mfb_reference(feat1, feat2, w_i, b_i, w_q, b_q, C, compute_dtype=jnp.bfloat16)
    assert out.shape == (B, FEAT)
    assert jnp.allclose(out, ref, atol=2e-3, rtol=2e-3), "mismatch vs reference (B=8)"

    # Test 2: exercises multi-tile grid + batch padding path.
    B2 = 40
    feat1b = jax.random.normal(k7, (B2, FEAT), dtype=jnp.float32)
    feat2b = jax.random.normal(k8, (B2, FEAT), dtype=jnp.float32)
    out2 = jax.block_until_ready(mfb_forward(feat1b, feat2b, *params))
    ref2 = mfb_reference(feat1b, feat2b, w_i, b_i, w_q, b_q, C, compute_dtype=jnp.bfloat16)
    assert out2.shape == (B2, FEAT)
    assert jnp.allclose(out2, ref2, atol=2e-3, rtol=2e-3), "mismatch vs reference (B=40)"

    print("KERNEL_OK")
</pallas_src>

<mosaic_0001>
module attributes {stable_mosaic.version = 11 : i64} {
  func.func @_mfb_kernel(%arg0: i32, %arg1: memref<8x32xbf16, #tpu.memory_space<vmem>>, %arg2: memref<8x32xbf16, #tpu.memory_space<vmem>>, %arg3: memref<32x128xbf16, #tpu.memory_space<vmem>>, %arg4: memref<1x128xf32, #tpu.memory_space<vmem>>, %arg5: memref<32x128xbf16, #tpu.memory_space<vmem>>, %arg6: memref<1x128xf32, #tpu.memory_space<vmem>>, %arg7: memref<8x32xf32, #tpu.memory_space<vmem>>) attributes {dimension_semantics = [#tpu.dimension_semantics<parallel>], iteration_bounds = array<i64: 1>, scalar_prefetch = 0 : i64, scratch_operands = 0 : i64, tpu.core_type = #tpu.core_type<tc>, window_params = [{transform_indices = @transform_0, window_bounds = array<i64: 8, 32>}, {transform_indices = @transform_1, window_bounds = array<i64: 8, 32>}, {pipeline_mode = #tpu.pipeline_mode<synchronous>, transform_indices = @transform_2, window_bounds = array<i64: 32, 128>}, {pipeline_mode = #tpu.pipeline_mode<synchronous>, transform_indices = @transform_3, window_bounds = array<i64: 1, 128>}, {pipeline_mode = #tpu.pipeline_mode<synchronous>, transform_indices = @transform_4, window_bounds = array<i64: 32, 128>}, {pipeline_mode = #tpu.pipeline_mode<synchronous>, transform_indices = @transform_5, window_bounds = array<i64: 1, 128>}, {transform_indices = @transform_6, window_bounds = array<i64: 8, 32>}]} {
    %c0 = arith.constant 0 : index
    %c0_0 = arith.constant 0 : index
    %0 = vector.load %arg1[%c0, %c0_0] : memref<8x32xbf16, #tpu.memory_space<vmem>>, vector<8x32xbf16>
    %c0_1 = arith.constant 0 : index
    %c0_2 = arith.constant 0 : index
    %1 = vector.load %arg3[%c0_1, %c0_2] : memref<32x128xbf16, #tpu.memory_space<vmem>>, vector<32x128xbf16>
    %cst = arith.constant dense<0.000000e+00> : vector<8x128xf32>
    %2 = tpu.matmul %0, %1, %cst {dimension_numbers = #tpu.dot_dimension_numbers<[1], [0], [0], [1], [0, 0, 1, 1], [], []>} : vector<8x32xbf16>, vector<32x128xbf16>, vector<8x128xf32> -> vector<8x128xf32>
    %c0_3 = arith.constant 0 : index
    %c0_4 = arith.constant 0 : index
    %3 = vector.load %arg4[%c0_3, %c0_4] : memref<1x128xf32, #tpu.memory_space<vmem>>, vector<1x128xf32>
    %4 = vector.broadcast %3 : vector<1x128xf32> to vector<8x128xf32>
    %5 = arith.addf %2, %4 : vector<8x128xf32>
    %c0_5 = arith.constant 0 : index
    %c0_6 = arith.constant 0 : index
    %6 = vector.load %arg2[%c0_5, %c0_6] : memref<8x32xbf16, #tpu.memory_space<vmem>>, vector<8x32xbf16>
    %c0_7 = arith.constant 0 : index
    %c0_8 = arith.constant 0 : index
    %7 = vector.load %arg5[%c0_7, %c0_8] : memref<32x128xbf16, #tpu.memory_space<vmem>>, vector<32x128xbf16>
    %cst_9 = arith.constant dense<0.000000e+00> : vector<8x128xf32>
    %8 = tpu.matmul %6, %7, %cst_9 {dimension_numbers = #tpu.dot_dimension_numbers<[1], [0], [0], [1], [0, 0, 1, 1], [], []>} : vector<8x32xbf16>, vector<32x128xbf16>, vector<8x128xf32> -> vector<8x128xf32>
    %c0_10 = arith.constant 0 : index
    %c0_11 = arith.constant 0 : index
    %9 = vector.load %arg6[%c0_10, %c0_11] : memref<1x128xf32, #tpu.memory_space<vmem>>, vector<1x128xf32>
    %10 = vector.broadcast %9 : vector<1x128xf32> to vector<8x128xf32>
    %11 = arith.addf %8, %10 : vector<8x128xf32>
    %12 = arith.mulf %5, %11 : vector<8x128xf32>
    %13 = vector.extract_strided_slice %12 {offsets = [0, 0], sizes = [8, 32], strides = [1, 1]} : vector<8x128xf32> to vector<8x32xf32>
    %14 = vector.extract_strided_slice %12 {offsets = [0, 32], sizes = [8, 32], strides = [1, 1]} : vector<8x128xf32> to vector<8x32xf32>
    %15 = arith.addf %13, %14 : vector<8x32xf32>
    %16 = vector.extract_strided_slice %12 {offsets = [0, 64], sizes = [8, 32], strides = [1, 1]} : vector<8x128xf32> to vector<8x32xf32>
    %17 = arith.addf %15, %16 : vector<8x32xf32>
    %18 = vector.extract_strided_slice %12 {offsets = [0, 96], sizes = [8, 32], strides = [1, 1]} : vector<8x128xf32> to vector<8x32xf32>
    %19 = arith.addf %17, %18 : vector<8x32xf32>
    %20 = arith.mulf %19, %19 : vector<8x32xf32>
    %cst_12 = arith.constant dense<0.000000e+00> : vector<8xf32>
    %21 = vector.multi_reduction <add>, %20, %cst_12 [1] : vector<8x32xf32> to vector<8xf32>
    %22 = vector.shape_cast %21 : vector<8xf32> to vector<8x1xf32>
    %cst_13 = arith.constant 1.000000e-24 : f32
    %23 = vector.broadcast %cst_13 : f32 to vector<8x1xf32>
    %24 = arith.maximumf %22, %23 : vector<8x1xf32>
    %25 = math.rsqrt %24 : vector<8x1xf32>
    %26 = vector.broadcast %25 : vector<8x1xf32> to vector<8x32xf32>
    %27 = arith.mulf %19, %26 : vector<8x32xf32>
    %c0_14 = arith.constant 0 : index
    %c0_15 = arith.constant 0 : index
    %28 = vector.load %arg7[%c0_14, %c0_15] : memref<8x32xf32, #tpu.memory_space<vmem>>, vector<8x32xf32>
    tpu.vector_store %arg7[%c0_14, %c0_15], %27 {strides = array<i32>} : memref<8x32xf32, #tpu.memory_space<vmem>>, vector<8x32xf32>,
    return
  }
  func.func @transform_0(%arg0: i32) -> (i32, i32) {
    %c0_i32 = arith.constant 0 : i32
    %c0_i32_0 = arith.constant 0 : i32
    return %arg0, %c0_i32 : i32, i32
  }
  func.func @transform_1(%arg0: i32) -> (i32, i32) {
    %c0_i32 = arith.constant 0 : i32
    %c0_i32_0 = arith.constant 0 : i32
    return %arg0, %c0_i32 : i32, i32
  }
  func.func @transform_2(%arg0: i32) -> (i32, i32) {
    %c0_i32 = arith.constant 0 : i32
    %c0_i32_0 = arith.constant 0 : i32
    %c0_i32_1 = arith.constant 0 : i32
    return %c0_i32, %c0_i32_0 : i32, i32
  }
  func.func @transform_3(%arg0: i32) -> (i32, i32) {
    %c0_i32 = arith.constant 0 : i32
    %c0_i32_0 = arith.constant 0 : i32
    %c0_i32_1 = arith.constant 0 : i32
    return %c0_i32, %c0_i32_0 : i32, i32
  }
  func.func @transform_4(%arg0: i32) -> (i32, i32) {
    %c0_i32 = arith.constant 0 : i32
    %c0_i32_0 = arith.constant 0 : i32
    %c0_i32_1 = arith.constant 0 : i32
    return %c0_i32, %c0_i32_0 : i32, i32
  }
  func.func @transform_5(%arg0: i32) -> (i32, i32) {
    %c0_i32 = arith.constant 0 : i32
    %c0_i32_0 = arith.constant 0 : i32
    %c0_i32_1 = arith.constant 0 : i32
    return %c0_i32, %c0_i32_0 : i32, i32
  }
  func.func @transform_6(%arg0: i32) -> (i32, i32) {
    %c0_i32 = arith.constant 0 : i32
    %c0_i32_0 = arith.constant 0 : i32
    return %arg0, %c0_i32 : i32, i32
  }
}

</mosaic_0001>

<bundles_post_ra>
// kernel: tpu_custom_call.1
= control target key start
LH: loop header
LB: loop body
LE: loop exit
PB: predicated region body
PF: predicated region fallthrough
CT: control target
= control target key end

     0   :  { %11 = vsyncpa [#allocation3], 0  ;;  %s536_s0 = inlined_call_operand.hbm [shape: bf16[8,32], index: 0, kind: input, shape index: {}]   ;;  %s537_s1 = inlined_call_operand.hbm [shape: bf16[8,32], index: 1, kind: input, shape index: {}]   ;;  %s538_s2 = inlined_call_operand.hbm [shape: bf16[32,128], index: 2, kind: input, shape index: {}]   ;;  %s539_s3 = inlined_call_operand.vmem [shape: f32[1,128], index: 3, kind: input, shape index: {}]   ;;  %s540_s4 = inlined_call_operand.hbm [shape: bf16[32,128], index: 4, kind: input, shape index: {}]   ;;  %s541_s5 = inlined_call_operand.vmem [shape: f32[1,128], index: 5, kind: input, shape index: {}]   ;;  %s542_s6 = inlined_call_operand.hbm [shape: f32[8,32], index: 6, kind: output, shape index: {}]  }
   0x1   :  { %12 = vsyncpa [#allocation6], 0 }
   0x2   :  { %13 = vsyncpa [#allocation9], 0 }
   0x3   :  { %14 = vsyncpa [#allocation4], 0  ;;  %s415_s21 = smov [#allocation5]   ;;  %s416_s23 = smov [#allocation2]  }
   0x4   :  { %s31_s22 = sshll.u32 %s415_s21, 4  ;;  %s21_s24 = sshll.u32 %s416_s23, 4  ;;  %s32_s22 = int_to_ptr.vmem [resolvable:$true] %s31_s22  ;;  %s22_s24 = int_to_ptr.vmem [resolvable:$true] %s21_s24 }
   0x5   :  { %s297_s27 = scalar_lea.hbm %s537_s1, 64 }
   0x6   :  { %p298_p0 = scmp.ne.s32.totalorder %s537_s1, %s297_s27  ;;  %p301_p1 = scmp.lt.u32.totalorder %s297_s27, %s537_s1 }
   0x8   :  { %p303_p2 = pnand %p301_p1, %p298_p0 }
   0xa   :  { %306 = shalt.err (!%p303_p2)
}
   0xb   :  { %s307_s8 = scalar_lea.vmem %s32_s22, 64  ;;  %p312_p4 = scmp.lt.s32.totalorder %s32_s22, %s32_s22 }
   0xc   :  { %p308_p3 = scmp.ne.s32.totalorder %s32_s22, %s307_s8  ;;  %p313_p5 = scmp.lt.s32.totalorder %s307_s8, %s307_s8 }
   0xe   :  { %p314_p6 = por %p313_p5, %p312_p4 }
  0x10   :  { %p315_p7 = pnand %p314_p6, %p308_p3 }
  0x12   :  { %318 = shalt.err (!%p315_p7)
}
  0x13   :  { %34 = dma.hbm_to_vmem [thread:$0]  %s537_s1, 64, %s32_s22, [#allocation6]  }
  0x14   :  { %s319_s13 = scalar_lea.hbm %s536_s0, 64 }
  0x15   :  { %p320_p8 = scmp.ne.s32.totalorder %s536_s0, %s319_s13  ;;  %p323_p9 = scmp.lt.u32.totalorder %s319_s13, %s536_s0 }
  0x17   :  { %p325_p10 = pnand %p323_p9, %p320_p8 }
  0x19   :  { %328 = shalt.err (!%p325_p10)
}
  0x1a   :  { %s329_s18 = scalar_lea.vmem %s22_s24, 64  ;;  %p334_p12 = scmp.lt.s32.totalorder %s22_s24, %s22_s24 }
  0x1b   :  { %p330_p11 = scmp.ne.s32.totalorder %s22_s24, %s329_s18  ;;  %p335_p13 = scmp.lt.s32.totalorder %s329_s18, %s329_s18 }
  0x1d   :  { %p336_p0 = por %p335_p13, %p334_p12 }
  0x1f   :  { %p337_p1 = pnand %p336_p0, %p330_p11 }
  0x21   :  { %340 = shalt.err (!%p337_p1)
}
  0x22   :  { %24 = dma.hbm_to_vmem [thread:$0]  %s536_s0, 64, %s22_s24, [#allocation3]  }
  0x23   :  { %s417_s20 = smov [#allocation7]   ;;  %s341_s25 = scalar_lea.hbm %s538_s2, 256 }
  0x24   :  { %s40_s21 = sshll.u32 %s417_s20, 4  ;;  %p342_p2 = scmp.ne.s32.totalorder %s538_s2, %s341_s25  ;;  %s41_s21 = int_to_ptr.vmem [resolvable:$true] %s40_s21 }
  0x25   :  { %p345_p3 = scmp.lt.u32.totalorder %s341_s25, %s538_s2 }
  0x27   :  { %p347_p4 = pnand %p345_p3, %p342_p2 }
  0x29   :  { %350 = shalt.err (!%p347_p4)
}
  0x2a   :  { %s351_s30 = scalar_lea.vmem %s41_s21, 256  ;;  %p356_p6 = scmp.lt.s32.totalorder %s41_s21, %s41_s21 }
  0x2b   :  { %p352_p5 = scmp.ne.s32.totalorder %s41_s21, %s351_s30  ;;  %p357_p7 = scmp.lt.s32.totalorder %s351_s30, %s351_s30 }
  0x2d   :  { %p358_p8 = por %p357_p7, %p356_p6 }
  0x2f   :  { %p359_p9 = pnand %p358_p8, %p352_p5 }
  0x31   :  { %362 = shalt.err (!%p359_p9)
}
  0x32   :  { %s418_s0 = smov 64   ;;  %s419_s24 = smov 4  }
  0x33   :  { %46 = dma.hbm_to_vmem [thread:$0]  %s538_s2, 256, %s41_s21, [#allocation6], %s418_s0, %s418_s0, %s419_s24  }
  0x34   :  { %s420_s9 = smov [#allocation8]   ;;  %s363_s13 = scalar_lea.hbm %s540_s4, 256 }
  0x35   :  { %s54_s10 = sshll.u32 %s420_s9, 4  ;;  %p364_p10 = scmp.ne.s32.totalorder %s540_s4, %s363_s13  ;;  %s55_s10 = int_to_ptr.vmem [resolvable:$true] %s54_s10 }
  0x36   :  { %p367_p11 = scmp.lt.u32.totalorder %s363_s13, %s540_s4 }
  0x38   :  { %p369_p12 = pnand %p367_p11, %p364_p10 }
  0x3a   :  { %372 = shalt.err (!%p369_p12)
}
  0x3b   :  { %s373_s18 = scalar_lea.vmem %s55_s10, 256  ;;  %p378_p0 = scmp.lt.s32.totalorder %s55_s10, %s55_s10 }
  0x3c   :  { %p374_p13 = scmp.ne.s32.totalorder %s55_s10, %s373_s18  ;;  %p379_p1 = scmp.lt.s32.totalorder %s373_s18, %s373_s18 }
  0x3e   :  { %p380_p2 = por %p379_p1, %p378_p0 }
  0x40   :  { %p381_p3 = pnand %p380_p2, %p374_p13 }
  0x42   :  { %384 = shalt.err (!%p381_p3)
}
  0x43   :  { %60 = dma.hbm_to_vmem [thread:$0]  %s540_s4, 256, %s55_s10, [#allocation9], %s418_s0, %s418_s0, %s419_s24  }
  0x44   :  { %407 = dma.done.wait [#allocation3], 64  }
  0x45   :  { %408 = vsyncadd [#allocation3], 4294967232 }
  0x46   :  { %409 = dma.done.wait [#allocation6], 320  }
  0x47   :  { %410 = vsyncadd [#allocation6], 4294966976 }
  0x48   :  { %411 = dma.done.wait [#allocation9], 256  }
  0x49   :  { %412 = vsyncadd [#allocation9], 4294967040  ;;  %v421_v0 = vmov 0.0   ;;  %vm422_vm0 = vmmov 0   ;;  %v291_v1 = vld [vmem:[#allocation7] sm:$0xff]   ;;  %v292_v2 = vld [vmem:[#allocation8] sm:$0xff]  }
  0x4a   :  { %264 = vmatprep.subr.bf16.mxu0 %v421_v0  ;;  %272 = vmatprep.subr.bf16.mxu1 %v421_v0  ;;  %v293_v3 = vld [vmem:[#allocation7 + $0x8] sm:$0xff]   ;;  %v294_v4 = vld [vmem:[#allocation8 + $0x8] sm:$0xff]   ;;  %vm100_vm1 = vcmask 261120   ;;  %s423_s22 = smov 32   ;;  %s424_s23 = smov 96  }
  0x4b   :  { %268 = vmatprep.mubr.msk.bf16.mxu0 %vm422_vm0, %v421_v0  ;;  %276 = vmatprep.mubr.msk.bf16.mxu1 %vm422_vm0, %v421_v0  ;;  %v76_v5 = vld [vmem:[#allocation2] sm:$0xf]  ;;  %v144_v6 = vld [vmem:[#allocation5] sm:$0xf] }
  0x4c   :  { %265 = vmatpush3.bf16.msra.mxu0 %v291_v1  ;;  %273 = vmatpush3.bf16.msra.mxu1 %v292_v2  ;;  %v250_v7 = vld [vmem:[%s539_s3] ss:$0 sm:$0xff]  ;;  %s425_s3 = smov [#allocation10]  }
  0x4d   :  { %266 = vmatprep.subr.bf16.mxu0 %v421_v0  ;;  %274 = vmatprep.subr.bf16.mxu1 %v421_v0  ;;  %v254_v8 = vld [vmem:[%s541_s5] ss:$0 sm:$0xff]  ;;  %s239_s5 = sshll.u32 %s425_s3, 4  ;;  %s240_s5 = int_to_ptr.vmem [resolvable:$true] %s239_s5 }
  0x4e   :  { %s385_s25 = scalar_lea.vmem %s240_s5, 128  ;;  %p390_p5 = scmp.lt.s32.totalorder %s240_s5, %s240_s5 }
  0x4f   :  { %p386_p4 = scmp.ne.s32.totalorder %s240_s5, %s385_s25  ;;  %p391_p6 = scmp.lt.s32.totalorder %s385_s25, %s385_s25 }
  0x50   :  { %267 = vmatpush3.bf16.msra.mxu0 %v293_v3  ;;  %275 = vmatpush3.bf16.msra.mxu1 %v294_v4 }
  0x51   :  { %p392_p7 = por %p391_p6, %p390_p5 }
  0x53   :  { %269 = vmatmul.mubr.msk.bf16.vlgmr.msra.gmra.mrb[0].mxu0 %vm100_vm1, %v76_v5  ;;  %277 = vmatmul.mubr.msk.bf16.vlgmr.msra.gmra.mrb[0].mxu1 %vm100_vm1, %v144_v6  ;;  %p393_p8 = pnand %p392_p7, %p386_p4 }
 0x126   :  { %v138_v9 = vpop.f32.mrb[0].mxu0  ;;  %v205_v11 = vpop.f32.mrb[0].mxu1 }
 0x127   :  { %v139_v10 = vadd.f32 %v250_v7, %v138_v9  ;;  %v270_v12 = vpop.f32.mrb[1].mxu0  ;;  %v206_v13 = vadd.f32 %v254_v8, %v205_v11  ;;  %v278_v14 = vpop.f32.mrb[1].mxu1 }
 0x128   :  { %v141_v15 = vpop.f32.mrb[2].mxu0  ;;  %v208_v16 = vpop.f32.mrb[2].mxu1 }
 0x129   :  { %v271_v17 = vpop.f32.mrb[3].mxu0  ;;  %v211_v18 = vmul.f32 %v206_v13, %v139_v10  ;;  %v279_v19 = vpop.f32.mrb[3].mxu1 }
 0x12b   :  { %221 = vrot.lane.b32.xlu1 %v211_v18, %s423_s22  ;;  %213 = vrot.lane.b32.xlu0 %v211_v18, %s424_s23 }
 0x12f   :  { %217 = vrot.lane.b32.xlu0 %v211_v18, %s418_s0 }
 0x19d   :  { %v214_v20 = vpop.permute.xlu0 %213  ;;  %v222_v24 = vpop.permute.xlu1 %221 }
 0x19e   :  { %v216_v21 = vadd.f32 %v214_v20, %v211_v18 }
 0x1a1   :  { %v218_v22 = vpop.permute.xlu0 %217 }
 0x1a2   :  { %v220_v23 = vadd.f32 %v218_v22, %v216_v21 }
 0x1a4   :  { %v224_v25 = vadd.f32 %v222_v24, %v220_v23 }
 0x1a6   :  { %v225_v26 = vmul.f32 %v224_v25, %v224_v25 }
 0x1a8   :  { %v226_v27 = vsel %vm100_vm1, %v225_v26, 0.0 }
 0x1a9   :  { %227 = vadd.xlane.f32.xlu1 %v226_v27 }
 0x236   :  { %v228_v28 = vpop.xlane.xlu1 %227 }
 0x237   :  { %v229_v29 = vmax.f32 %v228_v28, 1e-24 }
 0x239   :  { %295 = vrsqrt.f32 %v229_v29 }
 0x243   :  { %v296_v30 = vpop.eup %295 }
 0x244   :  { %v231_v31 = vmul.f32 %v296_v30, %v224_v25 }
 0x246   :  { %232 = vst.msk [vmem:[#allocation10] sm:$0xff] %vm100_vm1, %v231_v31 }
 0x247   :  { %396 = shalt.err (!%p393_p8)
}
 0x248   :  { %s397_s28 = scalar_lea.hbm %s542_s6, 128 }
 0x249   :  { %p398_p9 = scmp.ne.s32.totalorder %s542_s6, %s397_s28  ;;  %p401_p10 = scmp.lt.u32.totalorder %s397_s28, %s542_s6 }
 0x24b   :  { %p403_p11 = pnand %p401_p10, %p398_p9 }
 0x24d   :  { %406 = shalt.err (!%p403_p11)
}
 0x24e   :  { %242 = dma.vmem_to_hbm [thread:$0]  %s240_s5, 128, %s542_s6, [#allocation4]  }
 0x24f   :  { %413 = dma.done.wait [#allocation4], 128  }
 0x250   :  { %414 = vsyncadd [#allocation4], 4294967168 }
 0x251   :  { %246 = vsyncpa [#allocation3], 1 }
 0x252   :  { %247 = vsyncpa [#allocation6], 1 }
 0x253   :  { %248 = vsyncpa [#allocation9], 1 }
 0x254   :  { %249 = vsyncpa [#allocation4], 1 }

</bundles_post_ra>
